<compile_context>
chip_gen: v6e
topology: v6e:2x2x1
jax: 0.10.0
libtpu: 0.0.40
codegen_flags: <defaults>
</compile_context>

<pallas_src>
import functools

import jax
import jax.numpy as jnp
from jax.experimental import pallas as pl
from jax.experimental.pallas import tpu as pltpu


def _round_up(v, m):
    return ((v + m - 1) // m) * m


def _focal_loss_kernel(x_ref, t_ref, out_ref, *, gamma, zero_label, stage,
                       n_rows, tile_n, mask_tail):
    x = x_ref[...].astype(jnp.float32)
    t = t_ref[...].astype(jnp.float32)

    # torch.where(isnan | isinf, 0, x) as a single compare+select.
    ax = jnp.abs(x)
    finite = ax < jnp.inf            # False for +/-inf and NaN
    x = jnp.where(finite, x, 0.0)
    ax = jnp.where(finite, ax, 0.0)

    # Shared sub-expressions: one exp (EUP), one log (EUP), one approx recip (EUP).
    e = jnp.exp(-ax)                          # exp(-|x|)
    denom = 1.0 + e
    inv = pl.reciprocal(denom, approx=True)   # 1 / (1 + exp(-|x|))
    log_denom = jnp.log(denom)                # softplus(-|x|) = log1p(exp(-|x|))
    relu_x = jnp.maximum(x, 0.0)
    nonneg = x >= 0.0

    # 1 - sigmoid(x), numerically stable, no extra transcendental.
    one_minus_p = jnp.where(nonneg, e * inv, inv)

    # focal_pw = (1 - sigmoid(x)) ** gamma  (repeated multiply for int gamma)
    if float(gamma) == int(gamma) and int(gamma) >= 0:
        g = int(gamma)
        if g == 0:
            focal_pw = jnp.ones_like(one_minus_p)
        else:
            focal_pw = one_minus_p
            for _ in range(g - 1):
                focal_pw = focal_pw * one_minus_p
    else:
        focal_pw = jnp.power(one_minus_p, gamma)

    # BCEWithLogits(x, y) = max(x, 0) - x*y + log(1 + exp(-|x|))
    bce_posi = relu_x - x + log_denom         # y = 1
    bce_nega = relu_x + log_denom             # y = 0

    posi_mask = (t == 1.0).astype(jnp.float32)
    nega_mask = (t == -1.0).astype(jnp.float32)

    contrib = posi_mask * (focal_pw * bce_posi) + nega_mask * bce_nega
    if stage != 2:
        zero_mask = (t == 0.0).astype(jnp.float32)
        bce_zero = relu_x - x * zero_label + log_denom
        contrib = contrib + zero_mask * bce_zero
    # NOTE: focal_nw = sigmoid(x)**gamma is unused in the reference forward.

    if mask_tail:
        i = pl.program_id(0)
        row_ids = i * tile_n + jax.lax.broadcasted_iota(jnp.int32, contrib.shape, 0)
        contrib = jnp.where(row_ids < n_rows, contrib, 0.0)

    # One sublane (XLU) reduction per large tile; lane-dense (1, C) store.
    out_ref[...] = jnp.sum(contrib, axis=0, keepdims=True)


def focal_loss_5th(logit, target, *, stage=2, gamma=2.0, alpha=1.0,
                   zero_smoothing_label=0.45, tile_n=None):
    """Pallas implementation of FocalLoss5th.forward.

    logit, target: (N, C) arrays of identical shape (targets in {-1, 0, 1};
    any float / int dtype).  Returns a scalar float32 loss.
    `alpha` is kept for signature parity (unused in the reference forward).
    """
    del alpha
    N, C = logit.shape
    assert target.shape == (N, C)

    if tile_n is None:
        # ~2 MiB per (widest) input block: large enough to amortize per-step
        # overhead, small enough that 2 inputs x 2 pipeline buffers stay well
        # under the scoped-VMEM defaults on v5e (16 MiB) and v7x (32 MiB).
        itemsize = max(jnp.dtype(logit.dtype).itemsize,
                       jnp.dtype(target.dtype).itemsize)
        tile_n = (2 * 1024 * 1024) // (C * itemsize)
        tile_n = min(max(tile_n, 8), 4096)
    # keep the block a multiple of 8 sublanes and no larger than (padded) N
    tile_n = max(8, _round_up(min(tile_n, _round_up(N, 8)), 8))
    num_blocks = pl.cdiv(N, tile_n)

    kernel = functools.partial(
        _focal_loss_kernel,
        gamma=float(gamma),
        zero_label=float(zero_smoothing_label),
        stage=int(stage),
        n_rows=N,
        tile_n=tile_n,
        mask_tail=(N % tile_n != 0),
    )

    partials = pl.pallas_call(
        kernel,
        out_shape=jax.ShapeDtypeStruct((num_blocks, C), jnp.float32),
        grid_spec=pltpu.PrefetchScalarGridSpec(
            num_scalar_prefetch=0,
            grid=(num_blocks,),
            in_specs=[
                pl.BlockSpec((tile_n, C), lambda i: (i, 0)),
                pl.BlockSpec((tile_n, C), lambda i: (i, 0)),
            ],
            out_specs=pl.BlockSpec((1, C), lambda i: (i, 0)),
        ),
        compiler_params=pltpu.CompilerParams(
            dimension_semantics=("parallel",),
        ),
    )(logit, target)

    # Tiny cross-block / cross-lane reduction outside the kernel.
    # (.mean() of the 0-d result in the reference is a no-op.)
    return jnp.sum(partials)


def _reference_focal_loss(logit, target, *, stage=2, gamma=2.0,
                          zero_smoothing_label=0.45):
    x = logit.astype(jnp.float32)
    x = jnp.where(jnp.isnan(x), 0.0, x)
    x = jnp.where(jnp.isinf(x), 0.0, x)
    t = target.astype(jnp.float32)
    posi_mask = (t == 1.0).astype(jnp.float32)
    nega_mask = (t == -1.0).astype(jnp.float32)
    zero_mask = (t == 0.0).astype(jnp.float32)

    def bce(x, y):
        return jnp.maximum(x, 0.0) - x * y + jnp.log1p(jnp.exp(-jnp.abs(x)))

    probas = jax.nn.sigmoid(x)
    focal_pw = (1.0 - probas) ** gamma
    posi = jnp.sum(bce(x, 1.0) * posi_mask * focal_pw)
    nega = jnp.sum(bce(x, 0.0) * nega_mask)
    zero = jnp.sum(bce(x, zero_smoothing_label) * zero_mask)
    return posi + nega if stage == 2 else posi + nega + zero


if __name__ == "__main__":
    key = jax.random.PRNGKey(0)
    k_logit, k_target = jax.random.split(key)

    N, C = 16, 256
    logit = jax.random.normal(k_logit, (N, C), dtype=jnp.float32) * 3.0
    # targets take values in {-1, 0, 1}; int8 to cut HBM bytes
    target = jax.random.randint(k_target, (N, C), -1, 2).astype(jnp.int8)

    # sprinkle some NaN / inf to exercise the sanitization path
    logit = logit.at[0, 0].set(jnp.nan)
    logit = logit.at[1, 5].set(jnp.inf)
    logit = logit.at[2, 7].set(-jnp.inf)

    loss_fn = jax.jit(functools.partial(focal_loss_5th, stage=2, gamma=2.0))
    loss = jax.block_until_ready(loss_fn(logit, target))

    ref = _reference_focal_loss(logit, target, stage=2, gamma=2.0)
    # rtol slack covers the EUP approximate reciprocal used for the sigmoid.
    assert jnp.allclose(loss, ref, rtol=1e-2, atol=1e-2), (loss, ref)

    print("KERNEL_OK")
</pallas_src>

<mosaic_0001>
module attributes {stable_mosaic.version = 11 : i64} {
  func.func @_focal_loss_kernel(%arg0: i32, %arg1: memref<16x256xf32, #tpu.memory_space<vmem>>, %arg2: memref<16x256xi8, #tpu.memory_space<vmem>>, %arg3: memref<1x256xf32, #tpu.memory_space<vmem>>) attributes {dimension_semantics = [#tpu.dimension_semantics<parallel>], iteration_bounds = array<i64: 1>, scalar_prefetch = 0 : i64, scratch_operands = 0 : i64, tpu.core_type = #tpu.core_type<tc>, window_params = [{transform_indices = @transform_0, window_bounds = array<i64: 16, 256>}, {transform_indices = @transform_1, window_bounds = array<i64: 16, 256>}, {transform_indices = @transform_2, window_bounds = array<i64: 1, 256>}]} {
    %c0 = arith.constant 0 : index
    %c0_0 = arith.constant 0 : index
    %0 = vector.load %arg1[%c0, %c0_0] : memref<16x256xf32, #tpu.memory_space<vmem>>, vector<16x256xf32>
    %c0_1 = arith.constant 0 : index
    %c0_2 = arith.constant 0 : index
    %1 = vector.load %arg2[%c0_1, %c0_2] : memref<16x256xi8, #tpu.memory_space<vmem>>, vector<16x256xi8>
    %2 = arith.sitofp %1 : vector<16x256xi8> to vector<16x256xf32>
    %3 = math.absf %0 : vector<16x256xf32>
    %cst = arith.constant 0x7F800000 : f32
    %4 = vector.broadcast %cst : f32 to vector<16x256xf32>
    %5 = arith.cmpf olt, %3, %4 : vector<16x256xf32>
    %cst_3 = arith.constant 0.000000e+00 : f32
    %6 = vector.broadcast %cst_3 : f32 to vector<16x256xf32>
    %7 = arith.select %5, %0, %6 : vector<16x256xi1>, vector<16x256xf32>
    %cst_4 = arith.constant 0.000000e+00 : f32
    %8 = vector.broadcast %cst_4 : f32 to vector<16x256xf32>
    %9 = arith.select %5, %3, %8 : vector<16x256xi1>, vector<16x256xf32>
    %cst_5 = arith.constant 0.000000e+00 : f32
    %10 = vector.broadcast %cst_5 : f32 to vector<16x256xf32>
    %11 = arith.subf %10, %9 : vector<16x256xf32>
    %12 = math.exp %11 : vector<16x256xf32>
    %cst_6 = arith.constant 1.000000e+00 : f32
    %13 = vector.broadcast %cst_6 : f32 to vector<16x256xf32>
    %14 = arith.addf %13, %12 : vector<16x256xf32>
    %15 = tpu.reciprocal %14 {approx = true} : vector<16x256xf32> -> vector<16x256xf32>
    %16 = math.log %14 : vector<16x256xf32>
    %cst_7 = arith.constant 0.000000e+00 : f32
    %17 = vector.broadcast %cst_7 : f32 to vector<16x256xf32>
    %18 = arith.maximumf %7, %17 : vector<16x256xf32>
    %cst_8 = arith.constant 0.000000e+00 : f32
    %19 = vector.broadcast %cst_8 : f32 to vector<16x256xf32>
    %20 = arith.cmpf oge, %7, %19 : vector<16x256xf32>
    %21 = arith.mulf %12, %15 : vector<16x256xf32>
    %22 = arith.select %20, %21, %15 : vector<16x256xi1>, vector<16x256xf32>
    %23 = arith.mulf %22, %22 : vector<16x256xf32>
    %24 = arith.subf %18, %7 : vector<16x256xf32>
    %25 = arith.addf %24, %16 : vector<16x256xf32>
    %26 = arith.addf %18, %16 : vector<16x256xf32>
    %cst_9 = arith.constant 1.000000e+00 : f32
    %27 = vector.broadcast %cst_9 : f32 to vector<16x256xf32>
    %28 = arith.cmpf oeq, %2, %27 : vector<16x256xf32>
    %29 = arith.extui %28 : vector<16x256xi1> to vector<16x256xi32>
    %30 = arith.sitofp %29 : vector<16x256xi32> to vector<16x256xf32>
    %cst_10 = arith.constant -1.000000e+00 : f32
    %31 = vector.broadcast %cst_10 : f32 to vector<16x256xf32>
    %32 = arith.cmpf oeq, %2, %31 : vector<16x256xf32>
    %33 = arith.extui %32 : vector<16x256xi1> to vector<16x256xi32>
    %34 = arith.sitofp %33 : vector<16x256xi32> to vector<16x256xf32>
    %35 = arith.mulf %23, %25 : vector<16x256xf32>
    %36 = arith.mulf %30, %35 : vector<16x256xf32>
    %37 = arith.mulf %34, %26 : vector<16x256xf32>
    %38 = arith.addf %36, %37 : vector<16x256xf32>
    %cst_11 = arith.constant dense<0.000000e+00> : vector<256xf32>
    %39 = vector.multi_reduction <add>, %38, %cst_11 [0] : vector<16x256xf32> to vector<256xf32>
    %40 = vector.shape_cast %39 : vector<256xf32> to vector<1x256xf32>
    %c0_12 = arith.constant 0 : index
    %c0_13 = arith.constant 0 : index
    %41 = vector.load %arg3[%c0_12, %c0_13] : memref<1x256xf32, #tpu.memory_space<vmem>>, vector<1x256xf32>
    tpu.vector_store %arg3[%c0_12, %c0_13], %40 {strides = array<i32>} : memref<1x256xf32, #tpu.memory_space<vmem>>, vector<1x256xf32>,
    return
  }
  func.func @transform_0(%arg0: i32) -> (i32, i32) {
    %c0_i32 = arith.constant 0 : i32
    %c0_i32_0 = arith.constant 0 : i32
    return %arg0, %c0_i32 : i32, i32
  }
  func.func @transform_1(%arg0: i32) -> (i32, i32) {
    %c0_i32 = arith.constant 0 : i32
    %c0_i32_0 = arith.constant 0 : i32
    return %arg0, %c0_i32 : i32, i32
  }
  func.func @transform_2(%arg0: i32) -> (i32, i32) {
    %c0_i32 = arith.constant 0 : i32
    %c0_i32_0 = arith.constant 0 : i32
    return %arg0, %c0_i32 : i32, i32
  }
}

</mosaic_0001>

<bundles_post_ra>
// kernel: focal_loss_5th.1
= control target key start
LH: loop header
LB: loop body
LE: loop exit
PB: predicated region body
PF: predicated region fallthrough
CT: control target
= control target key end

     0   :  { %7 = vsyncpa [#allocation3], 0  ;;  %s397_s0 = inlined_call_operand.hbm [shape: f32[16,256], index: 0, kind: input, shape index: {}]   ;;  %s398_s1 = inlined_call_operand.hbm [shape: s8[16,256], index: 1, kind: input, shape index: {}]   ;;  %s399_s2 = inlined_call_operand.vmem [shape: f32[1,256], index: 2, kind: output, shape index: {}]  }
   0x1   :  { %8 = vsyncpa [#allocation5], 0  ;;  %s302_s9 = smov [#allocation2]  }
   0x2   :  { %s14_s10 = sshll.u32 %s302_s9, 4  ;;  %s15_s10 = int_to_ptr.vmem [resolvable:$true] %s14_s10 }
   0x3   :  { %s266_s11 = scalar_lea.vmem %s15_s10, 512  ;;  %p271_p1 = scmp.lt.s32.totalorder %s15_s10, %s15_s10 }
   0x4   :  { %p267_p0 = scmp.ne.s32.totalorder %s15_s10, %s266_s11  ;;  %p272_p2 = scmp.lt.s32.totalorder %s266_s11, %s266_s11 }
   0x6   :  { %p273_p3 = por %p272_p2, %p271_p1 }
   0x8   :  { %p274_p4 = pnand %p273_p3, %p267_p0 }
   0xa   :  { %277 = shalt.err (!%p274_p4)
}
   0xb   :  { %s303_s12 = smov 256   ;;  %s304_s13 = smov 16  }
   0xc   :  { %20 = dma.hbm_to_vmem [thread:$0]  %s397_s0, 512, %s15_s10, [#allocation3], %s303_s12, %s303_s12, %s304_s13  }
   0xd   :  { %s305_s16 = smov [#allocation4]  }
   0xe   :  { %s26_s17 = sshll.u32 %s305_s16, 4  ;;  %s27_s17 = int_to_ptr.vmem [resolvable:$true] %s26_s17 }
   0xf   :  { %s286_s18 = scalar_lea.vmem %s27_s17, 128  ;;  %p291_p6 = scmp.lt.s32.totalorder %s27_s17, %s27_s17 }
  0x10   :  { %p287_p5 = scmp.ne.s32.totalorder %s27_s17, %s286_s18  ;;  %p292_p7 = scmp.lt.s32.totalorder %s286_s18, %s286_s18 }
  0x12   :  { %p293_p8 = por %p292_p7, %p291_p6 }
  0x14   :  { %p294_p9 = pnand %p293_p8, %p287_p5 }
  0x16   :  { %297 = shalt.err (!%p294_p9)
}
  0x17   :  { %s306_s19 = smov 64   ;;  %s307_s20 = smov 4  }
  0x18   :  { %32 = dma.hbm_to_vmem [thread:$0]  %s398_s1, 128, %s27_s17, [#allocation5], %s306_s19, %s306_s19, %s307_s20  }
  0x19   :  { %298 = dma.done.wait [#allocation3], 512  }
  0x1a   :  { %299 = vsyncadd [#allocation3], 4294966784 }
  0x1b   :  { %300 = dma.done.wait [#allocation5], 128  }
  0x1c   :  { %301 = vsyncadd [#allocation5], 4294967168  ;;  %v39_v0 = vld [vmem:[#allocation2] sm:$0xff]  ;;  %v40_v1 = vld [vmem:[#allocation2 + $0x8] sm:$0xff]  ;;  %v308_v58 = vmov 0.0  }
  0x1d   :  { %v41_v2 = vld [vmem:[#allocation2 + $0x10] sm:$0xff]  ;;  %v42_v3 = vld [vmem:[#allocation2 + $0x18] sm:$0xff]  ;;  %v53_v4 = vand.u32 2147483647, %v39_v0  ;;  %v54_v5 = vand.u32 2147483647, %v40_v1 }
  0x1e   :  { %v55_v6 = vand.u32 2147483647, %v41_v2  ;;  %v56_v7 = vand.u32 2147483647, %v42_v3  ;;  %v221_v31 = vld [vmem:[#allocation4] sm:$0xff]  }
  0x1f   :  { %vm331_vm0 = vcmp.lt.f32.partialorder %v53_v4, inf  ;;  %vm335_vm1 = vcmp.lt.f32.partialorder %v54_v5, inf  ;;  %v222_v33 = vunpack.c.0.s8 %v221_v31  ;;  %v223_v34 = vunpack.c.1.s8 %v221_v31 }
  0x20   :  { %vm339_vm2 = vcmp.lt.f32.partialorder %v55_v6, inf  ;;  %vm343_vm3 = vcmp.lt.f32.partialorder %v56_v7, inf  ;;  %v65_v12 = vsel %vm331_vm0, %v53_v4, 0.0  ;;  %v66_v13 = vsel %vm335_vm1, %v54_v5, 0.0 }
  0x21   :  { %v67_v14 = vsel %vm339_vm2, %v55_v6, 0.0  ;;  %v68_v15 = vsel %vm343_vm3, %v56_v7, 0.0  ;;  %v69_v16 = vsub.f32 0.0, %v65_v12  ;;  %v70_v17 = vsub.f32 0.0, %v66_v13 }
  0x22   :  { %v71_v18 = vsub.f32 0.0, %v67_v14  ;;  %v72_v19 = vsub.f32 0.0, %v68_v15  ;;  %v224_v35 = vunpack.c.2.s8 %v221_v31  ;;  %v225_v36 = vunpack.c.3.s8 %v221_v31 }
  0x23   :  { %v73_v20 = vmul.f32 1.442695, %v69_v16  ;;  %v75_v21 = vmul.f32 1.442695, %v70_v17  ;;  %v357_v37 = vsel %vm331_vm0, %v39_v0, 0.0  ;;  %v361_v38 = vsel %vm335_vm1, %v40_v1, 0.0 }
  0x24   :  { %v77_v22 = vmul.f32 1.442695, %v71_v18  ;;  %v79_v23 = vmul.f32 1.442695, %v72_v19  ;;  %v365_v39 = vsel %vm339_vm2, %v41_v2, 0.0  ;;  %v369_v40 = vsel %vm343_vm3, %v42_v3, 0.0 }
  0x25   :  { %234 = vpow2.f32 %v73_v20  ;;  %v49_v41 = vcvt.s32.f32 %v222_v33  ;;  %v50_v42 = vcvt.s32.f32 %v223_v34  ;;  %v97_v43 = vmax.f32 %v357_v37, 0.0 }
  0x26   :  { %236 = vpow2.f32 %v75_v21  ;;  %v51_v44 = vcvt.s32.f32 %v224_v35  ;;  %v98_v45 = vmax.f32 %v361_v38, 0.0  ;;  %v99_v46 = vmax.f32 %v365_v39, 0.0 }
  0x27   :  { %238 = vpow2.f32 %v77_v22  ;;  %v100_v47 = vmax.f32 %v369_v40, 0.0  ;;  %v52_v48 = vcvt.s32.f32 %v225_v36  ;;  %vm101_vm4 = vcmp.ge.f32.partialorder %v357_v37, 0.0 }
  0x28   :  { %240 = vpow2.f32 %v79_v23  ;;  %vm102_vm5 = vcmp.ge.f32.partialorder %v361_v38, 0.0  ;;  %vm103_vm6 = vcmp.ge.f32.partialorder %v365_v39, 0.0  ;;  %vm104_vm7 = vcmp.ge.f32.partialorder %v369_v40, 0.0 }
  0x29   :  { %v117_v49 = vsub.f32 %v97_v43, %v357_v37  ;;  %vm129_vm8 = vcmp.eq.f32.partialorder %v49_v41, 1.0  ;;  %vm130_vm9 = vcmp.eq.f32.partialorder %v50_v42, 1.0  ;;  %v118_v51 = vsub.f32 %v98_v45, %v361_v38 }
  0x2a   :  { %v119_v52 = vsub.f32 %v99_v46, %v365_v39  ;;  %v120_v53 = vsub.f32 %v100_v47, %v369_v40  ;;  %vm131_vm10 = vcmp.eq.f32.partialorder %v51_v44, 1.0  ;;  %vm132_vm11 = vcmp.eq.f32.partialorder %v52_v48, 1.0 }
  0x2b   :  { %vm141_vm12 = vcmp.eq.f32.partialorder %v49_v41, -1.0  ;;  %vm142_vm13 = vcmp.eq.f32.partialorder %v50_v42, -1.0  ;;  %v212_v59 = vsel %vm129_vm8, 1.0, %v308_v58  ;;  %v213_v60 = vsel %vm130_vm9, 1.0, %v308_v58 }
  0x2c   :  { %vm143_vm14 = vcmp.eq.f32.partialorder %v51_v44, -1.0  ;;  %v214_v0 = vsel %vm131_vm10, 1.0, %v308_v58  ;;  %vm144_vm15 = vcmp.eq.f32.partialorder %v52_v48, -1.0  ;;  %v216_v4 = vsel %vm141_vm12, 1.0, %v308_v58 }
  0x2d   :  { %v217_v5 = vsel %vm142_vm13, 1.0, %v308_v58  ;;  %v218_v10 = vsel %vm143_vm14, 1.0, %v308_v58  ;;  %v219_v15 = vsel %vm144_vm15, 1.0, %v308_v58  ;;  %v215_v33 = vsel %vm132_vm11, 1.0, %v308_v58 }
  0x2e   :  { %v309_v48 = vmov 1966171168  }
  0x32   :  { %v235_v24 = vpop.eup %234 }
  0x33   :  { %v237_v25 = vpop.eup %236  ;;  %v81_v26 = vadd.f32 1.0, %v235_v24 }
  0x34   :  { %v239_v27 = vpop.eup %238  ;;  %v82_v28 = vadd.f32 1.0, %v237_v25 }
  0x35   :  { %v241_v29 = vpop.eup %240  ;;  %v83_v30 = vadd.f32 1.0, %v239_v27  ;;  %242 = vrcp.f32 %v81_v26 }
  0x36   :  { %v84_v32 = vadd.f32 1.0, %v241_v29  ;;  %244 = vrcp.f32 %v82_v28 }
  0x37   :  { %246 = vrcp.f32 %v83_v30 }
  0x38   :  { %248 = vrcp.f32 %v84_v32 }
  0x39   :  { %250 = vlog2.f32 %v81_v26 }
  0x3a   :  { %252 = vlog2.f32 %v82_v28 }
  0x3b   :  { %254 = vlog2.f32 %v83_v30 }
  0x3c   :  { %256 = vlog2.f32 %v84_v32 }
  0x42   :  { %v243_v50 = vpop.eup %242 }
  0x43   :  { %v245_v54 = vpop.eup %244  ;;  %v105_v55 = vmul.f32 %v243_v50, %v235_v24 }
  0x44   :  { %v247_v56 = vpop.eup %246  ;;  %v106_v57 = vmul.f32 %v245_v54, %v237_v25 }
  0x45   :  { %v249_v61 = vpop.eup %248  ;;  %v107_v62 = vmul.f32 %v247_v56, %v239_v27  ;;  %v109_v63 = vsel %vm101_vm4, %v105_v55, %v243_v50 }
  0x46   :  { %v251_v1 = vpop.eup %250  ;;  %v108_v2 = vmul.f32 %v249_v61, %v241_v29  ;;  %v110_v3 = vsel %vm102_vm5, %v106_v57, %v245_v54  ;;  %v113_v9 = vmul.f32 %v109_v63, %v109_v63  ;;  %v189_v54 = vlaneseq }
  0x47   :  { %v253_v6 = vpop.eup %252  ;;  %v90_v7 = vmul.f32 0.6931472, %v251_v1  ;;  %v111_v8 = vsel %vm103_vm6, %v107_v62, %v247_v56  ;;  %v114_v14 = vmul.f32 %v110_v3, %v110_v3 }
  0x48   :  { %v255_v11 = vpop.eup %254  ;;  %v92_v12 = vmul.f32 0.6931472, %v253_v6  ;;  %v112_v13 = vsel %vm104_vm7, %v108_v2, %v249_v61  ;;  %v115_v18 = vmul.f32 %v111_v8, %v111_v8  ;;  %vm203_vm0 = vcmp.lt.s32.totalorder %v189_v54, 256 }
  0x49   :  { %v257_v16 = vpop.eup %256  ;;  %v94_v17 = vmul.f32 0.6931472, %v255_v11  ;;  %v121_v19 = vadd.f32 %v117_v49, %v90_v7  ;;  %v125_v20 = vadd.f32 %v97_v43, %v90_v7  ;;  %v116_v22 = vmul.f32 %v112_v13, %v112_v13 }
  0x4a   :  { %v96_v21 = vmul.f32 0.6931472, %v257_v16  ;;  %v122_v23 = vadd.f32 %v118_v51, %v92_v12  ;;  %v126_v24 = vadd.f32 %v98_v45, %v92_v12 }
  0x4b   :  { %v123_v25 = vadd.f32 %v119_v52, %v94_v17  ;;  %v127_v26 = vadd.f32 %v99_v46, %v94_v17  ;;  %v153_v27 = vmul.f32 %v121_v19, %v113_v9  ;;  %v161_v28 = vmul.f32 %v216_v4, %v125_v20 }
  0x4c   :  { %v124_v29 = vadd.f32 %v120_v53, %v96_v21  ;;  %v128_v30 = vadd.f32 %v100_v47, %v96_v21  ;;  %v154_v31 = vmul.f32 %v122_v23, %v114_v14  ;;  %v162_v32 = vmul.f32 %v217_v5, %v126_v24 }
  0x4d   :  { %v155_v34 = vmul.f32 %v123_v25, %v115_v18  ;;  %v157_v35 = vmul.f32 %v212_v59, %v153_v27  ;;  %v163_v36 = vmul.f32 %v218_v10, %v127_v26  ;;  %v187_v53 = vunpack.c.l.s4 %v309_v48 }
  0x4e   :  { %v156_v37 = vmul.f32 %v124_v29, %v116_v22  ;;  %v158_v38 = vmul.f32 %v213_v60, %v154_v31  ;;  %v164_v39 = vmul.f32 %v219_v15, %v128_v30  ;;  %v190_v60 = vshrl.u32 %v189_v54, 7 }
  0x4f   :  { %v159_v40 = vmul.f32 %v214_v0, %v155_v34  ;;  %v165_v41 = vadd.f32 %v161_v28, %v157_v35  ;;  %v188_v59 = vunpack.c.0.s8 %v187_v53 }
  0x50   :  { %v160_v42 = vmul.f32 %v215_v33, %v156_v37  ;;  %v166_v43 = vadd.f32 %v162_v32, %v158_v38 }
  0x51   :  { %v167_v44 = vadd.f32 %v163_v36, %v159_v40  ;;  %v191_v1 = vsub.s32 %v188_v59, %v190_v60 }
  0x52   :  { %v168_v45 = vadd.f32 %v164_v39, %v160_v42 }
  0x53   :  { %v169_v46 = vadd.f32 %v167_v44, %v165_v41 }
  0x54   :  { %v176_v49 = vadd.f32 %v168_v45, %v166_v43 }
  0x55   :  { %v170_v50 = vrot.slane %v169_v46, 4 }
  0x56   :  { %v177_v47 = vrot.slane %v176_v49, 4 }
  0x57   :  { %v171_v51 = vadd.f32 %v170_v50, %v169_v46 }
  0x58   :  { %v178_v52 = vadd.f32 %v177_v47, %v176_v49 }
  0x59   :  { %v172_v55 = vrot.slane %v171_v51, 2 }
  0x5a   :  { %v179_v56 = vrot.slane %v178_v52, 2 }
  0x5b   :  { %v173_v57 = vadd.f32 %v172_v55, %v171_v51 }
  0x5c   :  { %v180_v58 = vadd.f32 %v179_v56, %v178_v52 }
  0x5d   :  { %v174_v61 = vrot.slane %v173_v57, 1 }
  0x5e   :  { %v181_v62 = vrot.slane %v180_v58, 1 }
  0x5f   :  { %v175_v63 = vadd.f32 %v174_v61, %v173_v57 }
  0x60   :  { %v182_v0 = vadd.f32 %v181_v62, %v180_v58 }
  0x62   :  { %v185_v2 = vcombine.low %v175_v63, %v182_v0 }
  0x64   :  { %v192_v3 = vrot.slane %v185_v2, %v191_v1 }
  0x66   :  { %v199_v4 = vrot.slane %v192_v3, %v191_v1 }
  0x68   :  { %205 = vst.msk [vmem:[%s399_s2] sm:$0x3] %vm203_vm0, %v199_v4 }
  0x69   :  { %210 = vsyncpa [#allocation3], 1 }
  0x6a   :  { %211 = vsyncpa [#allocation5], 1 }

</bundles_post_ra>
